<compile_context>
chip_gen: v7x
topology: tpu7x:2x2x1
jax: 0.10.0
libtpu: 0.0.40
codegen_flags: <defaults>
</compile_context>

<pallas_src>
import jax
import jax.numpy as jnp
from jax.experimental import pallas as pl
from jax.experimental.pallas import tpu as pltpu

_LANE = 128
_SUBLANE = 8
_TILE_B_MAX = 512  # sweet spot per measured mem-bound saturation (256-1024)


def _round_up(n, m):
    return ((n + m - 1) // m) * m


# ---------------------------------------------------------------------------
# Kernels
# ---------------------------------------------------------------------------
def _train_kernel(x_ref, mask_ref, w1_ref, b1_ref, w2_ref, b2_ref, o_ref):
    # Linear1 (MXU, bf16 operands, f32 accumulate) + bias + ReLU
    h = jnp.dot(x_ref[...].astype(jnp.bfloat16), w1_ref[...],
                preferred_element_type=jnp.float32)
    h = jnp.maximum(h + b1_ref[...], 0.0)
    # Dropout(0.5): keep-mask already pre-scaled by 1/(1-p)=2 -> one multiply.
    h = h * mask_ref[...]
    # Linear2 (MXU) + bias; output block is lane-dense (padded to 128).
    out = jnp.dot(h.astype(jnp.bfloat16), w2_ref[...],
                  preferred_element_type=jnp.float32)
    o_ref[...] = out + b2_ref[...]


def _eval_kernel(x_ref, w1_ref, b1_ref, o_ref):
    # layers[:2] == Linear1 + ReLU
    h = jnp.dot(x_ref[...].astype(jnp.bfloat16), w1_ref[...],
                preferred_element_type=jnp.float32)
    o_ref[...] = jnp.maximum(h + b1_ref[...], 0.0)


# ---------------------------------------------------------------------------
# Wrapper
# ---------------------------------------------------------------------------
def make_keep_mask(key, batch, hidden):
    """Bernoulli(0.5) keep-mask, True == keep (matches torch Dropout p=0.5)."""
    return jax.random.bernoulli(key, 0.5, (batch, hidden))


def bayesian_nn_forward(x, params, train=True, keep_mask=None, key=None):
    """params = (w1t, b1, w2t, b2); biases shaped (1, features)."""
    w1t, b1, w2t, b2 = params
    B, K = x.shape
    H = w1t.shape[1]
    O = w2t.shape[1]

    # Lane-dense padding (exact; padded rows/cols are zero and sliced off).
    H_pad = _round_up(H, _LANE)
    O_pad = _round_up(O, _LANE)

    tile_b = min(_TILE_B_MAX, _round_up(B, _SUBLANE))
    B_pad = _round_up(B, tile_b)
    grid = (B_pad // tile_b,)

    x_p = x.astype(jnp.float32)
    if B_pad != B:
        x_p = jnp.pad(x_p, ((0, B_pad - B), (0, 0)))

    # NOTE: in a real model these pads/casts would be done once at init time.
    w1_p = jnp.pad(w1t, ((0, 0), (0, H_pad - H))).astype(jnp.bfloat16)
    b1_p = jnp.pad(b1, ((0, 0), (0, H_pad - H))).astype(jnp.float32)

    x_spec = pl.BlockSpec((tile_b, K), lambda i: (i, 0))
    w1_spec = pl.BlockSpec((K, H_pad), lambda i: (0, 0))      # VMEM-resident
    b1_spec = pl.BlockSpec((1, H_pad), lambda i: (0, 0))
    cparams = pltpu.CompilerParams(dimension_semantics=("parallel",))

    if train:
        if keep_mask is None:
            if key is None:
                key = jax.random.PRNGKey(0)
            keep_mask = make_keep_mask(key, B, H)
        # Pre-fold the inverted-dropout scale 1/(1-p) = 2 into the mask.
        mask_p = keep_mask.astype(jnp.float32) * 2.0
        mask_p = jnp.pad(mask_p, ((0, B_pad - B), (0, H_pad - H)))

        w2_p = jnp.pad(w2t, ((0, H_pad - H), (0, O_pad - O))).astype(jnp.bfloat16)
        b2_p = jnp.pad(b2, ((0, 0), (0, O_pad - O))).astype(jnp.float32)

        flops = 2 * B_pad * (K * H_pad + H_pad * O_pad)
        bytes_accessed = (x_p.size * 4 + mask_p.size * 4 + w1_p.size * 2
                          + b1_p.size * 4 + w2_p.size * 2 + b2_p.size * 4
                          + B_pad * O_pad * 4)

        out = pl.pallas_call(
            _train_kernel,
            out_shape=jax.ShapeDtypeStruct((B_pad, O_pad), jnp.float32),
            grid=grid,
            in_specs=[
                x_spec,
                pl.BlockSpec((tile_b, H_pad), lambda i: (i, 0)),   # keep-mask
                w1_spec,
                b1_spec,
                pl.BlockSpec((H_pad, O_pad), lambda i: (0, 0)),    # w2 resident
                pl.BlockSpec((1, O_pad), lambda i: (0, 0)),        # b2 resident
            ],
            out_specs=pl.BlockSpec((tile_b, O_pad), lambda i: (i, 0)),
            compiler_params=cparams,
            cost_estimate=pl.CostEstimate(flops=flops, transcendentals=0,
                                          bytes_accessed=bytes_accessed),
        )(x_p, mask_p, w1_p, b1_p, w2_p, b2_p)
        return out[:B, :O]
    else:
        flops = 2 * B_pad * K * H_pad
        bytes_accessed = (x_p.size * 4 + w1_p.size * 2 + b1_p.size * 4
                          + B_pad * H_pad * 4)
        out = pl.pallas_call(
            _eval_kernel,
            out_shape=jax.ShapeDtypeStruct((B_pad, H_pad), jnp.float32),
            grid=grid,
            in_specs=[x_spec, w1_spec, b1_spec],
            out_specs=pl.BlockSpec((tile_b, H_pad), lambda i: (i, 0)),
            compiler_params=cparams,
            cost_estimate=pl.CostEstimate(flops=flops, transcendentals=0,
                                          bytes_accessed=bytes_accessed),
        )(x_p, w1_p, b1_p)
        return out[:B, :H]


def init_params(key, input_size, hidden_size, output_size):
    """PyTorch-style Linear init: U(-1/sqrt(fan_in), 1/sqrt(fan_in))."""
    k1, k2, k3, k4 = jax.random.split(key, 4)
    bound1 = 1.0 / jnp.sqrt(jnp.float32(input_size))
    bound2 = 1.0 / jnp.sqrt(jnp.float32(hidden_size))
    w1t = jax.random.uniform(k1, (input_size, hidden_size), jnp.float32, -bound1, bound1)
    b1 = jax.random.uniform(k2, (1, hidden_size), jnp.float32, -bound1, bound1)
    w2t = jax.random.uniform(k3, (hidden_size, output_size), jnp.float32, -bound2, bound2)
    b2 = jax.random.uniform(k4, (1, output_size), jnp.float32, -bound2, bound2)
    return (w1t, b1, w2t, b2)


if __name__ == "__main__":
    key = jax.random.PRNGKey(0)
    kx, kp = jax.random.split(key)

    batch, input_size, hidden_size, output_size = 8, 32, 64, 4
    x = jax.random.normal(kx, (batch, input_size), dtype=jnp.float32)
    params = init_params(kp, input_size, hidden_size, output_size)
    w1t, b1, w2t, b2 = params

    def ref_linear1_relu(xv):
        h = jnp.dot(xv.astype(jnp.bfloat16), w1t.astype(jnp.bfloat16),
                    preferred_element_type=jnp.float32)
        return jnp.maximum(h + b1, 0.0)

    # ---- eval path: Linear1 + ReLU only (layers[:2]) -----------------------
    out_eval = jax.block_until_ready(bayesian_nn_forward(x, params, train=False))
    ref_eval = ref_linear1_relu(x)
    assert out_eval.shape == (batch, hidden_size)
    assert jnp.allclose(out_eval, ref_eval, atol=1e-2, rtol=1e-2)

    # ---- train path: Linear -> ReLU -> Dropout(0.5) -> Linear --------------
    keep = make_keep_mask(jax.random.PRNGKey(42), batch, hidden_size)
    out_train = jax.block_until_ready(
        bayesian_nn_forward(x, params, train=True, keep_mask=keep))
    h_ref = ref_linear1_relu(x) * keep.astype(jnp.float32) * 2.0
    ref_train = jnp.dot(h_ref.astype(jnp.bfloat16), w2t.astype(jnp.bfloat16),
                        preferred_element_type=jnp.float32) + b2
    assert out_train.shape == (batch, output_size)
    assert jnp.allclose(out_train, ref_train, atol=1e-2, rtol=1e-2)

    print("KERNEL_OK")
</pallas_src>

<mosaic_0001>
module attributes {stable_mosaic.version = 11 : i64} {
  func.func @_eval_kernel(%arg0: i32, %arg1: memref<8x32xf32, #tpu.memory_space<vmem>>, %arg2: memref<32x128xbf16, #tpu.memory_space<vmem>>, %arg3: memref<1x128xf32, #tpu.memory_space<vmem>>, %arg4: memref<8x128xf32, #tpu.memory_space<vmem>>) attributes {dimension_semantics = [#tpu.dimension_semantics<parallel>], iteration_bounds = array<i64: 1>, scalar_prefetch = 0 : i64, scratch_operands = 0 : i64, tpu.core_type = #tpu.core_type<tc>, window_params = [{transform_indices = @transform_0, window_bounds = array<i64: 8, 32>}, {pipeline_mode = #tpu.pipeline_mode<synchronous>, transform_indices = @transform_1, window_bounds = array<i64: 32, 128>}, {pipeline_mode = #tpu.pipeline_mode<synchronous>, transform_indices = @transform_2, window_bounds = array<i64: 1, 128>}, {transform_indices = @transform_3, window_bounds = array<i64: 8, 128>}]} {
    %c0 = arith.constant 0 : index
    %c0_0 = arith.constant 0 : index
    %0 = vector.load %arg1[%c0, %c0_0] : memref<8x32xf32, #tpu.memory_space<vmem>>, vector<8x32xf32>
    %1 = arith.truncf %0 : vector<8x32xf32> to vector<8x32xbf16>
    %c0_1 = arith.constant 0 : index
    %c0_2 = arith.constant 0 : index
    %2 = vector.load %arg2[%c0_1, %c0_2] : memref<32x128xbf16, #tpu.memory_space<vmem>>, vector<32x128xbf16>
    %cst = arith.constant dense<0.000000e+00> : vector<8x128xf32>
    %3 = tpu.matmul %1, %2, %cst {dimension_numbers = #tpu.dot_dimension_numbers<[1], [0], [0], [1], [0, 0, 1, 1], [], []>} : vector<8x32xbf16>, vector<32x128xbf16>, vector<8x128xf32> -> vector<8x128xf32>
    %c0_3 = arith.constant 0 : index
    %c0_4 = arith.constant 0 : index
    %4 = vector.load %arg3[%c0_3, %c0_4] : memref<1x128xf32, #tpu.memory_space<vmem>>, vector<1x128xf32>
    %5 = vector.broadcast %4 : vector<1x128xf32> to vector<8x128xf32>
    %6 = arith.addf %3, %5 : vector<8x128xf32>
    %cst_5 = arith.constant 0.000000e+00 : f32
    %7 = vector.broadcast %cst_5 : f32 to vector<8x128xf32>
    %8 = arith.maximumf %6, %7 : vector<8x128xf32>
    %c0_6 = arith.constant 0 : index
    %c0_7 = arith.constant 0 : index
    %9 = vector.load %arg4[%c0_6, %c0_7] : memref<8x128xf32, #tpu.memory_space<vmem>>, vector<8x128xf32>
    tpu.vector_store %arg4[%c0_6, %c0_7], %8 {strides = array<i32>} : memref<8x128xf32, #tpu.memory_space<vmem>>, vector<8x128xf32>,
    return
  }
  func.func @transform_0(%arg0: i32) -> (i32, i32) {
    %c0_i32 = arith.constant 0 : i32
    %c0_i32_0 = arith.constant 0 : i32
    return %arg0, %c0_i32 : i32, i32
  }
  func.func @transform_1(%arg0: i32) -> (i32, i32) {
    %c0_i32 = arith.constant 0 : i32
    %c0_i32_0 = arith.constant 0 : i32
    %c0_i32_1 = arith.constant 0 : i32
    return %c0_i32, %c0_i32_0 : i32, i32
  }
  func.func @transform_2(%arg0: i32) -> (i32, i32) {
    %c0_i32 = arith.constant 0 : i32
    %c0_i32_0 = arith.constant 0 : i32
    %c0_i32_1 = arith.constant 0 : i32
    return %c0_i32, %c0_i32_0 : i32, i32
  }
  func.func @transform_3(%arg0: i32) -> (i32, i32) {
    %c0_i32 = arith.constant 0 : i32
    %c0_i32_0 = arith.constant 0 : i32
    return %arg0, %c0_i32 : i32, i32
  }
}

</mosaic_0001>

<bundles_post_ra>
// kernel: tpu_custom_call.1
= control target key start
LH: loop header
LB: loop body
LE: loop exit
PB: predicated region body
PF: predicated region fallthrough
CT: control target
= control target key end

     0   :  { %8 = vsyncpa [#allocation3], 0  ;;  %s298_s0 = inlined_call_operand.hbm [shape: f32[8,32], index: 0, kind: input, shape index: {}]   ;;  %s299_s1 = inlined_call_operand.hbm [shape: bf16[32,128], index: 1, kind: input, shape index: {}]   ;;  %s300_s2 = inlined_call_operand.vmem [shape: f32[1,128], index: 2, kind: input, shape index: {}]   ;;  %s301_s3 = inlined_call_operand.hbm [shape: f32[8,128], index: 3, kind: output, shape index: {}]  }
   0x1   :  { %9 = vsyncpa [#allocation6], 0 }
   0x2   :  { %10 = vsyncpa [#allocation4], 0  ;;  %s225_s12 = smov [#allocation2]   ;;  %s226_s14 = smov [#allocation5]  }
   0x3   :  { %s17_s13 = sshll.u32 %s225_s12, 4  ;;  %s26_s15 = sshll.u32 %s226_s14, 4  ;;  %s18_s13 = int_to_ptr.vmem [resolvable:$true] %s17_s13  ;;  %s252_s15 = int_to_ptr.vmem [resolvable:$true] %s26_s15 }
   0x4   :  { %s153_s18 = scalar_lea.hbm %s298_s0, 128 }
   0x5   :  { %p154_p0 = scmp.ne.s32.totalorder %s298_s0, %s153_s18  ;;  %p157_p1 = scmp.lt.u32.totalorder %s153_s18, %s298_s0 }
   0x7   :  { %p159_p2 = pnand %p157_p1, %p154_p0 }
   0x9   :  { %162 = shalt.err (!%p159_p2)
}
   0xa   :  { %s163_s23 = scalar_lea.vmem %s18_s13, 128  ;;  %p168_p4 = scmp.lt.s32.totalorder %s18_s13, %s18_s13 }
   0xb   :  { %p164_p3 = scmp.ne.s32.totalorder %s18_s13, %s163_s23  ;;  %p169_p5 = scmp.lt.s32.totalorder %s163_s23, %s163_s23 }
   0xd   :  { %p170_p6 = por %p169_p5, %p168_p4 }
   0xf   :  { %p171_p7 = pnand %p170_p6, %p164_p3 }
  0x11   :  { %174 = shalt.err (!%p171_p7)
}
  0x12   :  { %20 = dma.hbm_to_vmem [thread:$0]  %s298_s0, 128, %s18_s13, [#allocation3]  }
  0x13   :  { %s175_s28 = scalar_lea.hbm %s299_s1, 256 }
  0x14   :  { %p176_p8 = scmp.ne.s32.totalorder %s299_s1, %s175_s28  ;;  %p179_p9 = scmp.lt.u32.totalorder %s175_s28, %s299_s1 }
  0x16   :  { %p181_p10 = pnand %p179_p9, %p176_p8 }
  0x18   :  { %184 = shalt.err (!%p181_p10)
}
  0x19   :  { %s185_s6 = scalar_lea.vmem %s252_s15, 256  ;;  %p190_p12 = scmp.lt.s32.totalorder %s252_s15, %s252_s15 }
  0x1a   :  { %p186_p11 = scmp.ne.s32.totalorder %s252_s15, %s185_s6  ;;  %p191_p13 = scmp.lt.s32.totalorder %s185_s6, %s185_s6 }
  0x1c   :  { %p192_p0 = por %p191_p13, %p190_p12 }
  0x1e   :  { %p193_p1 = pnand %p192_p0, %p186_p11 }
  0x20   :  { %196 = shalt.err (!%p193_p1)
}
  0x21   :  { %s227_s0 = smov 64   ;;  %s228_s7 = smov 4  }
  0x22   :  { %32 = dma.hbm_to_vmem [thread:$0]  %s299_s1, 256, %s252_s15, [#allocation6], %s227_s0, %s227_s0, %s228_s7  }
  0x23   :  { %219 = dma.done.wait [#allocation3], 128  }
  0x24   :  { %220 = vsyncadd [#allocation3], 4294967168 }
  0x25   :  { %221 = dma.done.wait [#allocation6], 256  }
  0x26   :  { %222 = vsyncadd [#allocation6], 4294967040  ;;  %v229_v0 = vmov 0.0   ;;  %vm230_vm0 = vmmov 0   ;;  %v151_v1 = vld [vmem:[#allocation5] sm:$0xff]   ;;  %v152_v2 = vld [vmem:[#allocation5 + $0x8] sm:$0xff]  }
  0x27   :  { %136 = vmatprep.subr.bf16.mxu0 %v229_v0  ;;  %140 = vmatprep.mubr.msk.bf16.mxu0 %vm230_vm0, %v229_v0  ;;  %v42_v3 = vld [vmem:[#allocation2] sm:$0xff]  ;;  %vm67_vm1 = vcmask 261120   ;;  %s231_s1 = smov [#allocation7]  }
  0x28   :  { %137 = vmatpush3.bf16.msra.mxu0 %v151_v1  ;;  %v43_v4 = vpack.c.bf16 %v42_v3, %v42_v3  ;;  %v129_v5 = vld [vmem:[%s300_s2] ss:$0 sm:$0xff]  ;;  %s119_s12 = sshll.u32 %s231_s1, 4  ;;  %s120_s12 = int_to_ptr.vmem [resolvable:$true] %s119_s12 }
  0x29   :  { %138 = vmatprep.subr.bf16.mxu0 %v229_v0  ;;  %s197_s13 = scalar_lea.vmem %s120_s12, 128  ;;  %p202_p3 = scmp.lt.s32.totalorder %s120_s12, %s120_s12 }
  0x2a   :  { %p198_p2 = scmp.ne.s32.totalorder %s120_s12, %s197_s13  ;;  %p203_p4 = scmp.lt.s32.totalorder %s197_s13, %s197_s13 }
  0x2c   :  { %139 = vmatpush3.bf16.msra.mxu0 %v152_v2  ;;  %p204_p5 = por %p203_p4, %p202_p3 }
  0x2e   :  { %p205_p6 = pnand %p204_p5, %p198_p2 }
  0x2f   :  { %141 = vmatmul.mubr.msk.bf16.vlgmr.msra.gmra.mrb[0].mxu0 %vm67_vm1, %v43_v4 }
 0x102   :  { %v105_v6 = vpop.f32.mrb[0].mxu0 }
 0x103   :  { %v106_v7 = vadd.f32 %v129_v5, %v105_v6  ;;  %v142_v8 = vpop.f32.mrb[1].mxu0 }
 0x104   :  { %v108_v9 = vpop.f32.mrb[2].mxu0 }
 0x105   :  { %v111_v10 = vmax.f32 %v106_v7, 0.0  ;;  %v143_v11 = vpop.f32.mrb[3].mxu0 }
 0x107   :  { %112 = vst [vmem:[#allocation7] sm:$0xff] %v111_v10 }
 0x108   :  { %208 = shalt.err (!%p205_p6)
}
 0x109   :  { %s209_s2 = scalar_lea.hbm %s301_s3, 128 }
 0x10a   :  { %p210_p7 = scmp.ne.s32.totalorder %s301_s3, %s209_s2  ;;  %p213_p8 = scmp.lt.u32.totalorder %s209_s2, %s301_s3 }
 0x10c   :  { %p215_p9 = pnand %p213_p8, %p210_p7 }
 0x10e   :  { %218 = shalt.err (!%p215_p9)
}
 0x10f   :  { %122 = dma.vmem_to_hbm [thread:$0]  %s120_s12, 128, %s301_s3, [#allocation4]  }
 0x110   :  { %223 = dma.done.wait [#allocation4], 128  }
 0x111   :  { %224 = vsyncadd [#allocation4], 4294967168 }
 0x112   :  { %126 = vsyncpa [#allocation3], 1 }
 0x113   :  { %127 = vsyncpa [#allocation6], 1 }
 0x114   :  { %128 = vsyncpa [#allocation4], 1 }

</bundles_post_ra>
